<compile_context>
chip_gen: v5e
topology: v5e:2x2
jax: 0.10.0
libtpu: 0.0.40
codegen_flags: <defaults>
</compile_context>

<pallas_src>
import functools

import jax
import jax.numpy as jnp
from jax import lax
from jax.experimental import pallas as pl
from jax.experimental.pallas import tpu as pltpu

_LANE = 128
_SUB = 8


def _round_up(x, m):
    return (x + m - 1) // m * m


def _f32(x):
    return x if x.dtype == jnp.float32 else x.astype(jnp.float32)


def offset_pos_kernel(pred_ref, label_ref, out_ref, *, R, CH, P, KS_per,
                      rows_valid, needs_mask):
    # pred_ref:  (1, 2, R, 128)   offset predictions (xy)
    # label_ref: (1, 3, R, 128)   [xy targets ; positive mask]
    # out_ref:   (1, 2, 8, 128)   per-(batch, split) partials: [num ; den]
    k = pl.program_id(1)

    @pl.when(k == 0)
    def _init():
        out_ref[...] = jnp.zeros_like(out_ref)

    if P > 1:
        gb = (pl.program_id(0) % P) * KS_per + k     # unclamped global block id
    else:
        gb = k
    row0 = gb * R                                    # global row of block start

    n_chunks = R // CH

    def body(i, carry):
        num_acc, den_acc = carry
        start = pl.multiple_of(i * CH, _SUB)
        idx = pl.ds(start, CH)
        # read channel slices directly off the refs (no full-block value)
        px = _f32(pred_ref[0, 0, idx, :])            # (CH, 128)
        py = _f32(pred_ref[0, 1, idx, :])
        lx = _f32(label_ref[0, 0, idx, :])
        ly = _f32(label_ref[0, 1, idx, :])
        m = _f32(label_ref[0, 2, idx, :])

        dx = px - lx
        dy = py - ly
        adx = jnp.abs(dx)
        ady = jnp.abs(dy)
        # SmoothL1, beta = 1.0, reduction='none'
        slx = jnp.where(adx < 1.0, 0.5 * dx * dx, adx - 0.5)
        sly = jnp.where(ady < 1.0, 0.5 * dy * dy, ady - 0.5)
        num_c = m * (slx + sly)                      # (CH, 128)
        den_c = m
        if needs_mask:
            # cdiv-style edge blocks: rows past the array end hold undefined
            # data -> select 0 (jnp.where, so NaNs in garbage cannot leak).
            gr = lax.broadcasted_iota(jnp.int32, (CH, _LANE), 0) + (row0 + i * CH)
            valid = gr < rows_valid
            num_c = jnp.where(valid, num_c, 0.0)
            den_c = jnp.where(valid, den_c, 0.0)
        # leading-axis folds only -> pure VPU adds, no per-chunk cross-lane reduce
        num_acc = num_acc + num_c.reshape(CH // _SUB, _SUB, _LANE).sum(axis=0)
        den_acc = den_acc + den_c.reshape(CH // _SUB, _SUB, _LANE).sum(axis=0)
        return num_acc, den_acc

    zeros = jnp.zeros((_SUB, _LANE), jnp.float32)
    if n_chunks % 4 == 0:
        unroll = 4
    elif n_chunks % 2 == 0:
        unroll = 2
    else:
        unroll = 1
    num_acc, den_acc = lax.fori_loop(0, n_chunks, body, (zeros, zeros),
                                     unroll=unroll)

    out_ref[0, 0] = out_ref[0, 0] + num_acc
    out_ref[0, 1] = out_ref[0, 1] + den_acc


def offset_pos_loss(offset_pred, offset_label, *, rows_per_block=4096,
                    chunk_rows=256, spatial_splits=None):
    """offset_pred: (N, 2, H, W); offset_label: (N, 3, H, W) -> scalar f32 loss."""
    N, c_pred, H, W = offset_pred.shape
    assert c_pred == 2 and offset_label.shape == (N, 3, H, W)
    HW = H * W

    rows = pl.cdiv(HW, _LANE)            # 128-lane rows covering H*W
    rows8 = _round_up(rows, _SUB)        # array row dim kept a multiple of 8
    HW_pad = rows8 * _LANE

    pred_f = offset_pred.reshape(N, 2, HW)
    label_f = offset_label.reshape(N, 3, HW)
    if HW_pad != HW:
        # zero padding contributes 0 to both numerator and denominator
        # TODO(synk): fuse this lane pad into the upstream producer of
        # pred/label to avoid the extra HBM round trip when H*W % 1024 != 0.
        pad = HW_pad - HW
        pred_f = jnp.pad(pred_f, ((0, 0), (0, 0), (0, pad)))
        label_f = jnp.pad(label_f, ((0, 0), (0, 0), (0, pad)))
    pred_r = pred_f.reshape(N, 2, rows8, _LANE)       # lane-dense layout
    label_r = label_f.reshape(N, 3, rows8, _LANE)

    # Chunk / block sizing (all multiples of 8; R is a multiple of CH).
    CH = min(_round_up(max(int(chunk_rows), _SUB), _SUB), rows8)
    max_R = (rows8 // CH) * CH
    R = min(_round_up(max(int(rows_per_block), CH), CH), max_R)
    KS_total = pl.cdiv(rows8, R)         # real spatial blocks (cdiv, no block pad)

    # Split the spatial axis when the batch alone can't keep both v7x TCs busy.
    if spatial_splits is None:
        P = 2 if (N == 1 and KS_total >= 2) else 1
    else:
        P = max(1, int(spatial_splits))
    P = min(P, KS_total)
    KS_per = pl.cdiv(KS_total, P)

    # Mask needed if the last real block overhangs the array or if some (p, k)
    # steps are pure overflow (their DMA is clamped to the last real block).
    needs_mask = (P * KS_per * R != rows8)
    clamp_needed = (P * KS_per != KS_total)

    kern = functools.partial(
        offset_pos_kernel, R=R, CH=CH, P=P, KS_per=KS_per,
        rows_valid=rows8, needs_mask=needs_mask)

    def in_map(np_, k):
        if P > 1:
            n = np_ // P
            gb = (np_ % P) * KS_per + k
        else:
            n = np_
            gb = k
        if clamp_needed:
            gb = jnp.minimum(gb, KS_total - 1)   # keep the DMA in bounds
        return (n, 0, gb, 0)

    partials = pl.pallas_call(
        kern,
        out_shape=jax.ShapeDtypeStruct((N * P, 2, _SUB, _LANE), jnp.float32),
        grid_spec=pltpu.PrefetchScalarGridSpec(
            num_scalar_prefetch=0,
            grid=(N * P, KS_per),
            in_specs=[
                pl.BlockSpec((1, 2, R, _LANE), in_map),
                pl.BlockSpec((1, 3, R, _LANE), in_map),
            ],
            out_specs=pl.BlockSpec((1, 2, _SUB, _LANE),
                                   lambda np_, k: (np_, 0, 0, 0)),
        ),
        compiler_params=pltpu.CompilerParams(
            dimension_semantics=("parallel", "arbitrary"),
            # <= 32 MiB keeps headroom on v7x (64 MiB physical VMEM); v5e/v6e
            # could go higher, but the kernel is HBM-bound either way.
            vmem_limit_bytes=32 * 1024 * 1024,
        ),
    )(pred_r, label_r)

    # scalar epilogue (applied only after summing ALL partials, per reference)
    num = jnp.sum(partials[:, 0])
    den = jnp.sum(partials[:, 1])
    return 0.1 * num / jnp.maximum(1.0, den)


def offset_pos_ref(offset_pred, offset_label):
    """Pure-JAX reference of the PyTorch module."""
    mask = offset_label[:, 2, :, :][:, None, :, :]
    diff = offset_pred - offset_label[:, :2, :, :]
    ad = jnp.abs(diff)
    sl1 = jnp.where(ad < 1.0, 0.5 * diff * diff, ad - 0.5)
    num = jnp.sum(mask * sl1)
    den = jnp.maximum(1.0, jnp.sum(offset_label[:, 2, :, :]))
    return 0.1 * num / den


def _make_inputs(key, N, H, W):
    k_pred, k_xy, k_mask = jax.random.split(key, 3)
    offset_pred = jax.random.normal(k_pred, (N, 2, H, W), dtype=jnp.float32)
    label_xy = jax.random.normal(k_xy, (N, 2, H, W), dtype=jnp.float32)
    pos_mask = (jax.random.uniform(k_mask, (N, 1, H, W)) > 0.5).astype(jnp.float32)
    offset_label = jnp.concatenate([label_xy, pos_mask], axis=1)  # (N, 3, H, W)
    return offset_pred, offset_label


if __name__ == "__main__":
    key = jax.random.PRNGKey(0)
    k0, k1, k2 = jax.random.split(key, 3)

    # 1) primary small case, default (large-block) parameters
    pred0, lab0 = _make_inputs(k0, N=2, H=16, W=16)
    loss0 = offset_pos_loss(pred0, lab0)
    jax.block_until_ready(loss0)
    ref0 = offset_pos_ref(pred0, lab0)
    assert jnp.allclose(loss0, ref0, rtol=1e-5, atol=1e-6), (loss0, ref0)

    # 2) multi-step reduce axis + chunked inner loop (unroll=2) + in-kernel
    #    edge-block masking (rows8 = 24 not divisible by R = 16)
    pred1, lab1 = _make_inputs(k1, N=2, H=48, W=48)
    loss1 = offset_pos_loss(pred1, lab1, rows_per_block=16, chunk_rows=8)
    jax.block_until_ready(loss1)
    ref1 = offset_pos_ref(pred1, lab1)
    assert jnp.allclose(loss1, ref1, rtol=1e-5, atol=1e-6), (loss1, ref1)

    # 3) N=1 with the spatial split (v7x dual-core path), including a fully
    #    overflowing grid step (DMA clamped + contribution masked to zero)
    pred2, lab2 = _make_inputs(k2, N=1, H=52, W=52)
    loss2 = offset_pos_loss(pred2, lab2, rows_per_block=8, chunk_rows=8,
                            spatial_splits=2)
    jax.block_until_ready(loss2)
    ref2 = offset_pos_ref(pred2, lab2)
    assert jnp.allclose(loss2, ref2, rtol=1e-5, atol=1e-6), (loss2, ref2)

    print("KERNEL_OK")
</pallas_src>

<mosaic_0001>
module attributes {stable_mosaic.version = 11 : i64} {
  func.func @offset_pos_kernel(%arg0: i32, %arg1: i32, %arg2: memref<1x2x8x128xf32, #tpu.memory_space<vmem>>, %arg3: memref<1x3x8x128xf32, #tpu.memory_space<vmem>>, %arg4: memref<1x2x8x128xf32, #tpu.memory_space<vmem>>) attributes {dimension_semantics = [#tpu.dimension_semantics<parallel>, #tpu.dimension_semantics<arbitrary>], iteration_bounds = array<i64: 2, 1>, scalar_prefetch = 0 : i64, scratch_operands = 0 : i64, tpu.core_type = #tpu.core_type<tc>, window_params = [{transform_indices = @transform_0, window_bounds = array<i64: 1, 2, 8, 128>}, {transform_indices = @transform_1, window_bounds = array<i64: 1, 3, 8, 128>}, {transform_indices = @transform_2, window_bounds = array<i64: 1, 2, 8, 128>}]} {
    %c0_i32 = arith.constant 0 : i32
    %0 = arith.cmpi eq, %arg1, %c0_i32 : i32
    %1 = arith.extui %0 : i1 to i32
    %c0_i32_0 = arith.constant 0 : i32
    %2 = arith.cmpi ne, %1, %c0_i32_0 : i32
    scf.if %2 {
      %cst_38 = arith.constant 0.000000e+00 : f32
      %61 = vector.broadcast %cst_38 : f32 to vector<1x2x8x128xf32>
      %c0_39 = arith.constant 0 : index
      %c0_40 = arith.constant 0 : index
      %c0_41 = arith.constant 0 : index
      %c0_42 = arith.constant 0 : index
      %62 = vector.load %arg4[%c0_39, %c0_40, %c0_41, %c0_42] : memref<1x2x8x128xf32, #tpu.memory_space<vmem>>, vector<1x2x8x128xf32>
      tpu.vector_store %arg4[%c0_39, %c0_40, %c0_41, %c0_42], %61 {strides = array<i32>} : memref<1x2x8x128xf32, #tpu.memory_space<vmem>>, vector<1x2x8x128xf32>,
    } else {
    }
    %cst = arith.constant 0.000000e+00 : f32
    %3 = vector.broadcast %cst : f32 to vector<8x128xf32>
    %c0_i32_1 = arith.constant 0 : i32
    %c8_i32 = arith.constant 8 : i32
    %4 = arith.muli %c0_i32_1, %c8_i32 : i32
    %5 = tpu.assume_multiple %4, 8 : i32
    %c0 = arith.constant 0 : index
    %c0_2 = arith.constant 0 : index
    %6 = arith.index_cast %5 : i32 to index
    %c0_3 = arith.constant 0 : index
    %7 = vector.load %arg2[%c0, %c0_2, %6, %c0_3] : memref<1x2x8x128xf32, #tpu.memory_space<vmem>>, vector<1x1x8x128xf32>
    %8 = vector.shape_cast %7 : vector<1x1x8x128xf32> to vector<8x128xf32>
    %c0_4 = arith.constant 0 : index
    %c1 = arith.constant 1 : index
    %9 = arith.index_cast %5 : i32 to index
    %c0_5 = arith.constant 0 : index
    %10 = vector.load %arg2[%c0_4, %c1, %9, %c0_5] : memref<1x2x8x128xf32, #tpu.memory_space<vmem>>, vector<1x1x8x128xf32>
    %11 = vector.shape_cast %10 : vector<1x1x8x128xf32> to vector<8x128xf32>
    %c0_6 = arith.constant 0 : index
    %c0_7 = arith.constant 0 : index
    %12 = arith.index_cast %5 : i32 to index
    %c0_8 = arith.constant 0 : index
    %13 = vector.load %arg3[%c0_6, %c0_7, %12, %c0_8] : memref<1x3x8x128xf32, #tpu.memory_space<vmem>>, vector<1x1x8x128xf32>
    %14 = vector.shape_cast %13 : vector<1x1x8x128xf32> to vector<8x128xf32>
    %c0_9 = arith.constant 0 : index
    %c1_10 = arith.constant 1 : index
    %15 = arith.index_cast %5 : i32 to index
    %c0_11 = arith.constant 0 : index
    %16 = vector.load %arg3[%c0_9, %c1_10, %15, %c0_11] : memref<1x3x8x128xf32, #tpu.memory_space<vmem>>, vector<1x1x8x128xf32>
    %17 = vector.shape_cast %16 : vector<1x1x8x128xf32> to vector<8x128xf32>
    %c0_12 = arith.constant 0 : index
    %c2 = arith.constant 2 : index
    %18 = arith.index_cast %5 : i32 to index
    %c0_13 = arith.constant 0 : index
    %19 = vector.load %arg3[%c0_12, %c2, %18, %c0_13] : memref<1x3x8x128xf32, #tpu.memory_space<vmem>>, vector<1x1x8x128xf32>
    %20 = vector.shape_cast %19 : vector<1x1x8x128xf32> to vector<8x128xf32>
    %21 = arith.subf %8, %14 : vector<8x128xf32>
    %22 = arith.subf %11, %17 : vector<8x128xf32>
    %23 = math.absf %21 : vector<8x128xf32>
    %24 = math.absf %22 : vector<8x128xf32>
    %cst_14 = arith.constant 1.000000e+00 : f32
    %25 = vector.broadcast %cst_14 : f32 to vector<8x128xf32>
    %26 = arith.cmpf olt, %23, %25 : vector<8x128xf32>
    %cst_15 = arith.constant 5.000000e-01 : f32
    %27 = vector.broadcast %cst_15 : f32 to vector<8x128xf32>
    %28 = arith.mulf %27, %21 : vector<8x128xf32>
    %29 = arith.mulf %28, %21 : vector<8x128xf32>
    %cst_16 = arith.constant 5.000000e-01 : f32
    %30 = vector.broadcast %cst_16 : f32 to vector<8x128xf32>
    %31 = arith.subf %23, %30 : vector<8x128xf32>
    %32 = arith.select %26, %29, %31 : vector<8x128xi1>, vector<8x128xf32>
    %cst_17 = arith.constant 1.000000e+00 : f32
    %33 = vector.broadcast %cst_17 : f32 to vector<8x128xf32>
    %34 = arith.cmpf olt, %24, %33 : vector<8x128xf32>
    %cst_18 = arith.constant 5.000000e-01 : f32
    %35 = vector.broadcast %cst_18 : f32 to vector<8x128xf32>
    %36 = arith.mulf %35, %22 : vector<8x128xf32>
    %37 = arith.mulf %36, %22 : vector<8x128xf32>
    %cst_19 = arith.constant 5.000000e-01 : f32
    %38 = vector.broadcast %cst_19 : f32 to vector<8x128xf32>
    %39 = arith.subf %24, %38 : vector<8x128xf32>
    %40 = arith.select %34, %37, %39 : vector<8x128xi1>, vector<8x128xf32>
    %41 = arith.addf %32, %40 : vector<8x128xf32>
    %42 = arith.mulf %20, %41 : vector<8x128xf32>
    %43 = vector.shape_cast %42 : vector<8x128xf32> to vector<1x8x128xf32>
    %cst_20 = arith.constant dense<0.000000e+00> : vector<8x128xf32>
    %44 = vector.multi_reduction <add>, %43, %cst_20 [0] : vector<1x8x128xf32> to vector<8x128xf32>
    %45 = arith.addf %3, %44 : vector<8x128xf32>
    %46 = vector.shape_cast %20 : vector<8x128xf32> to vector<1x8x128xf32>
    %cst_21 = arith.constant dense<0.000000e+00> : vector<8x128xf32>
    %47 = vector.multi_reduction <add>, %46, %cst_21 [0] : vector<1x8x128xf32> to vector<8x128xf32>
    %48 = arith.addf %3, %47 : vector<8x128xf32>
    %c1_i32 = arith.constant 1 : i32
    %c0_22 = arith.constant 0 : index
    %c0_23 = arith.constant 0 : index
    %c0_24 = arith.constant 0 : index
    %c0_25 = arith.constant 0 : index
    %49 = vector.load %arg4[%c0_22, %c0_23, %c0_24, %c0_25] : memref<1x2x8x128xf32, #tpu.memory_space<vmem>>, vector<1x1x8x128xf32>
    %50 = vector.shape_cast %49 : vector<1x1x8x128xf32> to vector<8x128xf32>
    %51 = arith.addf %50, %45 : vector<8x128xf32>
    %c0_26 = arith.constant 0 : index
    %c0_27 = arith.constant 0 : index
    %c0_28 = arith.constant 0 : index
    %c0_29 = arith.constant 0 : index
    %52 = vector.load %arg4[%c0_26, %c0_27, %c0_28, %c0_29] : memref<1x2x8x128xf32, #tpu.memory_space<vmem>>, vector<1x1x8x128xf32>
    %53 = vector.shape_cast %52 : vector<1x1x8x128xf32> to vector<8x128xf32>
    %54 = vector.shape_cast %51 : vector<8x128xf32> to vector<1x1x8x128xf32>
    tpu.vector_store %arg4[%c0_26, %c0_27, %c0_28, %c0_29], %54 {strides = array<i32>} : memref<1x2x8x128xf32, #tpu.memory_space<vmem>>, vector<1x1x8x128xf32>,
    %c0_30 = arith.constant 0 : index
    %c1_31 = arith.constant 1 : index
    %c0_32 = arith.constant 0 : index
    %c0_33 = arith.constant 0 : index
    %55 = vector.load %arg4[%c0_30, %c1_31, %c0_32, %c0_33] : memref<1x2x8x128xf32, #tpu.memory_space<vmem>>, vector<1x1x8x128xf32>
    %56 = vector.shape_cast %55 : vector<1x1x8x128xf32> to vector<8x128xf32>
    %57 = arith.addf %56, %48 : vector<8x128xf32>
    %c0_34 = arith.constant 0 : index
    %c1_35 = arith.constant 1 : index
    %c0_36 = arith.constant 0 : index
    %c0_37 = arith.constant 0 : index
    %58 = vector.load %arg4[%c0_34, %c1_35, %c0_36, %c0_37] : memref<1x2x8x128xf32, #tpu.memory_space<vmem>>, vector<1x1x8x128xf32>
    %59 = vector.shape_cast %58 : vector<1x1x8x128xf32> to vector<8x128xf32>
    %60 = vector.shape_cast %57 : vector<8x128xf32> to vector<1x1x8x128xf32>
    tpu.vector_store %arg4[%c0_34, %c1_35, %c0_36, %c0_37], %60 {strides = array<i32>} : memref<1x2x8x128xf32, #tpu.memory_space<vmem>>, vector<1x1x8x128xf32>,
    return
  }
  func.func @transform_0(%arg0: i32, %arg1: i32) -> (i32, i32, i32, i32) {
    %c0_i32 = arith.constant 0 : i32
    %c0_i32_0 = arith.constant 0 : i32
    %c0_i32_1 = arith.constant 0 : i32
    return %arg0, %c0_i32, %arg1, %c0_i32_0 : i32, i32, i32, i32
  }
  func.func @transform_1(%arg0: i32, %arg1: i32) -> (i32, i32, i32, i32) {
    %c0_i32 = arith.constant 0 : i32
    %c0_i32_0 = arith.constant 0 : i32
    %c0_i32_1 = arith.constant 0 : i32
    return %arg0, %c0_i32, %arg1, %c0_i32_0 : i32, i32, i32, i32
  }
  func.func @transform_2(%arg0: i32, %arg1: i32) -> (i32, i32, i32, i32) {
    %c0_i32 = arith.constant 0 : i32
    %c0_i32_0 = arith.constant 0 : i32
    %c0_i32_1 = arith.constant 0 : i32
    %c0_i32_2 = arith.constant 0 : i32
    return %arg0, %c0_i32, %c0_i32_0, %c0_i32_1 : i32, i32, i32, i32
  }
}

</mosaic_0001>

<bundles_post_ra>
// kernel: tpu_custom_call.1
= control target key start
LH: loop header
LB: loop body
LE: loop exit
PB: predicated region body
PF: predicated region fallthrough
CT: control target
= control target key end

     0   :  { %7 = vsyncpa [#allocation3], 0  ;;  %s805_s0 = inlined_call_operand.hbm [shape: f32[2,2,8,128], index: 0, kind: input, shape index: {}]   ;;  %s806_s1 = inlined_call_operand.hbm [shape: f32[2,3,8,128], index: 1, kind: input, shape index: {}]   ;;  %s807_s2 = inlined_call_operand.hbm [shape: f32[2,2,8,128], index: 2, kind: output, shape index: {}]  }
   0x1   :  { %9 = vsyncpa [#allocation3 + $0x1], 0 }
   0x2   :  { %10 = vsyncpa [#allocation6], 0 }
   0x3   :  { %12 = vsyncpa [#allocation6 + $0x1], 0 }
   0x4   :  { %13 = vsyncpa [#allocation4], 0 }
   0x5   :  { %15 = vsyncpa [#allocation4 + $0x1], 0  ;;  %s661_s9 = smov 0   ;;  %s663_s10 = smov 0  }
   0x6   :  { %s665_s11 = smov 0   ;;  %s667_s12 = smov 0  }
   0x7   :  { %s669_s13 = smov 0   ;;  %s671_s14 = smov 0  }
   0x8 LB: > { %s394_s15 = sadd.s32 4294967295, %s640_s14   ;;  %s395_s16 = sadd.s32 4294967294, %s640_s14   ;;  %s640_s14 = sphi %s671_s14, %s21_s14   ;;  %s636_s13 = sphi %s669_s13, %s817_s13   ;;  %s632_s12 = sphi %s667_s12, %s816_s12   ;;  %s628_s11 = sphi %s665_s11, %s815_s11   ;;  %s624_s10 = sphi %s663_s10, %s814_s10   ;;  %s620_s9 = sphi %s661_s9, %s813_s9  }
   0x9   : > { %s33_s17 = sadd.s32 1, %s636_s13  ;;  %s42_s18 = sadd.s32 1, %s628_s11 }
   0xa   : > { %p35_p0 = scmp.ge.s32.totalorder %s33_s17, 2  ;;  %p49_p1 = scmp.ne.s32.totalorder %s628_s11, %s624_s10 }
   0xb   : > { %p50_p2 = scmp.eq.s32.totalorder %s640_s14, 0  ;;  %p55_p3 = scmp.ne.s32.totalorder %s624_s10, %s620_s9 }
   0xc   : > { %s819_s17 = smov (%p35_p0, %s33_s17), 0  ;;  %p56_p5 = scmp.eq.s32.totalorder %s394_s15, 0 }
   0xd   : > { %p702_p4 = por %p50_p2, %p49_p1  ;;  %s37_s20 = ssub.s32 %s636_s13, %s819_s17 }
   0xe   : > { %p107_p6 = scmp.eq.s32.totalorder %s394_s15, 1  ;;  %p40_p7 = scmp.eq.s32.totalorder %s37_s20, 0 }
   0xf   : > { %p708_p8 = por %p56_p5, %p55_p3  ;;  %p113_p10 = scmp.eq.s32.totalorder %s395_s16, 1 }
  0x10   : > { %p712_p9 = por %p107_p6, %p49_p1  ;;  %p397_p12 = scmp.ge.s32.totalorder %s640_s14, 2 }
  0x11   : > { %s717_s23 = scalar_select %p40_p7, %s628_s11, %s42_s18  }
  0x12   : > { %p719_p11 = por %p113_p10, %p55_p3  ;;  %p439_p13 = scmp.lt.s32.totalorder %s640_s14, 2 }
  0x13   : > { %s726_s25 = sand.u32 1, %s628_s11   ;;  %s417_s27 = sshll.u32 %s636_s13, 4 }
  0x14   : > { %s398_s26 = sshll.u32 %s726_s25, 4  ;;  %s143_s30 = scalar_lea.hbm %s805_s0, %s417_s27 }
  0x15   : > { %s137_s3 = scalar_lea.vmem [#allocation2], %s398_s26  ;;  %s144_s5 = sshll.u32 %s143_s30, 4  ;;  %s145_s5 = int_to_ptr.hbm [resolvable:$true] %s144_s5 }
  0x16   : > { %s146_s4 = sshll.u32 %s137_s3, 4  ;;  %p735_p0 = pnand %p439_p13, %p702_p4  ;;  %s147_s4 = int_to_ptr.vmem [resolvable:$true] %s146_s4 }
  0x17   : > { %p402_p1 = scmp.ge.s32.totalorder %s640_s14, 1  ;;  %s134_s7 = scalar_lea.sflag [#allocation3], %s726_s25 }
  0x18   : > { %s642_s8 = smov 128   ;;  %s643_s15 = smov 8  }
  0x19   : > { %431 = dma.hbm_to_vmem [thread:$0]  (!%p735_p0), %s145_s5, 256, %s147_s4, %s134_s7, %s642_s8, %s642_s8, %s643_s15  }
  0x1a   : > { %p177_p2 = scmp.lt.s32.totalorder %s640_s14, 3  ;;  %s419_s16 = smul.u32 24, %s726_s25 }
  0x1b   : > { %s420_s18 = smul.u32 24, %s636_s13  ;;  %s157_s30 = scalar_lea.sflag [#allocation6], %s726_s25 }
  0x1c   : > { %p178_p3 = pnand %p402_p1, %p177_p2  ;;  %s160_s27 = scalar_lea.vmem [#allocation5], %s419_s16 }
  0x1d   : > { %s166_s19 = scalar_lea.hbm %s806_s1, %s420_s18  ;;  %s169_s28 = sshll.u32 %s160_s27, 4  ;;  %s170_s28 = int_to_ptr.vmem [resolvable:$true] %s169_s28 }
  0x1e   : > { %s167_s29 = sshll.u32 %s166_s19, 4  ;;  %181 = sbr.rel (%p178_p3) target bundleno = 58 (0x3a), region = 28  ;;  %s168_s29 = int_to_ptr.hbm [resolvable:$true] %s167_s29 }
  0x1f   : > { %434 = dma.hbm_to_vmem [thread:$0]  (!%p735_p0), %s168_s29, 384, %s170_s28, %s157_s30, %s642_s8, %s642_s8, %s643_s15  }
  0x20   : > { %s753_s3 = sand.u32 (!%p178_p3), 1, %s624_s10  }
  0x21   : > { %s403_s4 = sshll.u32 (!%p178_p3), %s753_s3, 4  ;;  %s184_s5 = scalar_lea.sflag (!%p178_p3), [#allocation3], %s753_s3 }
  0x22   : > { %s187_s7 = scalar_lea.vmem (!%p178_p3), [#allocation2], %s403_s4 }
  0x23   : > { %607 = dma.done.wait (%p708_p8), %s184_s5, 256  }
  0x24   : > { %609 = vsyncadd (%p708_p8), %s184_s5, 4294967040  ;;  %s421_s25 = smul.u32 24, %s753_s3  ;;  %s194_s6 = scalar_lea.sflag [#allocation6], %s753_s3 }
  0x26   : > { %s197_s8 = scalar_lea.vmem [#allocation5], %s421_s25 }
  0x27   : > { %611 = dma.done.wait (%p708_p8), %s194_s6, 384  }
  0x28   : > { %613 = vsyncadd (%p708_p8), %s194_s6, 4294966912  ;;  %v230_v0 = vld [vmem:[%s187_s7] sm:$0xff]  ;;  %v405_v1 = vld [vmem:[%s187_s7 + $0x8] sm:$0xff]  ;;  %s223_s15 = scalar_lea.vmem [#allocation7], %s403_s4  ;;  %s418_s16 = sshll.u32 %s632_s12, 4 }
  0x29   : > { %v234_v2 = vld [vmem:[%s197_s8] sm:$0xff]  ;;  %v406_v3 = vld [vmem:[%s197_s8 + $0x8] sm:$0xff]  ;;  %v407_v4 = vld [vmem:[%s197_s8 + $0x10] sm:$0xff]  ;;  %s279_s20 = scalar_lea.hbm %s807_s2, %s418_s16  ;;  %s280_s26 = sshll.u32 %s223_s15, 4  ;;  %s281_s26 = int_to_ptr.vmem [resolvable:$true] %s280_s26 }
  0x2a   : > { %v240_v5 = vsub.f32 %v230_v0, %v234_v2  ;;  %v241_v6 = vsub.f32 %v405_v1, %v406_v3  ;;  %411 = vst [vmem:[%s223_s15 + $0x8] sm:$0xff] %v407_v4  ;;  %s282_s19 = sshll.u32 %s279_s20, 4  ;;  %s268_s12 = scalar_lea.sflag [#allocation4], %s753_s3  ;;  %s283_s19 = int_to_ptr.hbm [resolvable:$true] %s282_s19 }
  0x2b   : > { %s568_s27 = sshra.s32 %s283_s19, 4  ;;  %s574_s4 = scalar_lea.hbm %s807_s2, 32  ;;  %s569_s27 = int_to_ptr.hbm [resolvable:$true] %s568_s27 }
  0x2c   : > { %v242_v7 = vand.u32 2147483647, %v240_v5  ;;  %v245_v8 = vmul.f32 0.5, %v240_v5  ;;  %v243_v9 = vand.u32 2147483647, %v241_v6  ;;  %v250_v10 = vmul.f32 0.5, %v241_v6  ;;  %p575_p7 = scmp.lt.s32.totalorder %s569_s27, %s807_s2 }
  0x2d   : > { %s570_s28 = scalar_lea.hbm %s569_s27, 16 }
  0x2e   : > { %vm244_vm0 = vcmp.lt.f32.partialorder %v242_v7, 1.0  ;;  %v246_v11 = vmul.f32 %v245_v8, %v240_v5  ;;  %v408_v12 = vadd.f32 -0.5, %v242_v7  ;;  %vm249_vm1 = vcmp.lt.f32.partialorder %v243_v9, 1.0  ;;  %p571_p4 = scmp.ne.s32.totalorder %s569_s27, %s570_s28  ;;  %p576_p8 = scmp.lt.s32.totalorder %s574_s4, %s570_s28 }
  0x2f   : > { %v251_v13 = vmul.f32 %v250_v10, %v241_v6  ;;  %v409_v14 = vadd.f32 -0.5, %v243_v9 }
  0x30   : > { %v248_v15 = vsel %vm244_vm0, %v246_v11, %v408_v12  ;;  %p572_p5 = pnand %p571_p4, %p712_p9  ;;  %p577_p10 = por %p576_p8, %p575_p7 }
  0x31   : > { %v253_v16 = vsel %vm249_vm1, %v251_v13, %v409_v14 }
  0x32   : > { %v254_v17 = vadd.f32 %v253_v16, %v248_v15  ;;  %p573_p6 = pneg %p572_p5 }
  0x34   : > { %v255_v18 = vmul.f32 %v407_v4, %v254_v17  ;;  %p578_p13 = pnand %p577_p10, %p573_p6 }
  0x36   : > { %262 = vst [vmem:[%s223_s15] sm:$0xff] %v255_v18 }
  0x37   : > { %581 = shalt.err (!%p578_p13)
}
  0x38   : > { %s644_s3 = smov 128   ;;  %s645_s25 = smov 8  }
  0x39   : > { %426 = dma.vmem_to_hbm [thread:$0]  (%p712_p9), %s281_s26, 256, %s283_s19, %s268_s12, %s644_s3, %s644_s3, %s645_s25  }
  0x3a PF: > { %s297_s6 = sand.u32 1, %s620_s9   ;;  %p436_p0 = pnand %p397_p12, %p719_p11 }
  0x3b   : > { %s298_s8 = scalar_lea.sflag [#allocation4], %s297_s6 }
  0x3c   : > { %p437_p1 = pneg %p436_p0 }
  0x3e   : > { %615 = dma.done.wait (%p437_p1), %s298_s8, 256  }
  0x3f   : > { %617 = vsyncadd (%p437_p1), %s298_s8, 4294967040  ;;  %s21_s14 = sadd.s32 1, %s640_s14   ;;  %s813_s9 = smov %s624_s10 }
  0x40   : > { %p18_p2 = scmp.ge.s32.totalorder %s21_s14, 4   ;;  %s814_s10 = smov %s628_s11 }
  0x41   : > { %s815_s11 = smov %s717_s23  ;;  %s816_s12 = smov %s636_s13 }
  0x42   : > { %s817_s13 = smov %s819_s17  ;;  %20 = sbr.rel (!%p18_p2) target bundleno = 8 (0x8), region = 94 }
  0x47   :  { %304 = vsyncpa [#allocation3], 1 }
  0x48   :  { %306 = vsyncpa [#allocation3 + $0x1], 1 }
  0x49   :  { %307 = vsyncpa [#allocation6], 1 }
  0x4a   :  { %309 = vsyncpa [#allocation6 + $0x1], 1 }
  0x4b   :  { %310 = vsyncpa [#allocation4], 1 }
  0x4c   :  { %312 = vsyncpa [#allocation4 + $0x1], 1 }

</bundles_post_ra>
